<compile_context>
chip_gen: v7x
topology: tpu7x:2x2x1
jax: 0.10.0
libtpu: 0.0.40
codegen_flags: <defaults>
</compile_context>

<pallas_src>
import jax
import jax.numpy as jnp
from jax.experimental import pallas as pl
from jax.experimental.pallas import tpu as pltpu


def _fused_affine_kernel(x_ref, wb_ref, o_ref):
    """out = x @ W + b, with W and b packed into wb_ref.

    wb_ref layout: rows [0, K) are the folded weight in (in, out) layout,
    row K is the folded bias. Contraction dim is tiny (K=2), so compute as an
    unrolled VPU MAC:
      out[:, j] = sum_k x[:, k] * W[k, j] + b[j]
    """
    x = x_ref[...]                        # (N, K)
    wb = wb_ref[...]                      # (K+1, D_out)
    k_dim = x.shape[1]

    # First MAC step folded with the bias init; (1, d_out) rows broadcast
    # implicitly over the batch (sublane) dim.
    acc = (x[:, 0:1].astype(jnp.float32) * wb[0:1, :].astype(jnp.float32)
           + wb[k_dim:k_dim + 1, :].astype(jnp.float32))
    # Remaining (static, tiny) contraction steps: 1 vmul + 1 vadd each.
    for k in range(1, k_dim):
        acc = acc + x[:, k:k + 1].astype(jnp.float32) * wb[k:k + 1, :].astype(jnp.float32)

    o_ref[...] = acc.astype(o_ref.dtype)


def fold_params(wa, ba, wb, bb):
    """One-time parameter fold (call at parameter-load time, NOT per forward).

    b(a(x) + a(x)) = (2*y) @ Wb^T + bb with y = x @ Wa^T + ba
                   = x @ (2 Wa^T Wb^T) + (2 ba Wb^T + bb)
    Returns a single packed (d_in + 1, d_out) array: weight rows then bias row.
    """
    wa = wa.astype(jnp.float32)
    ba = ba.astype(jnp.float32)
    wb = wb.astype(jnp.float32)
    bb = bb.astype(jnp.float32)
    w_fused = 2.0 * (wa.T @ wb.T)                 # (d_in, d_out)
    b_fused = 2.0 * (ba @ wb.T) + bb              # (d_out,)
    return jnp.concatenate([w_fused, b_fused[None, :]], axis=0)  # (d_in+1, d_out)


def model_forward(x, wb_packed):
    """x: (N, d_in) -> (N, d_out), computing b(a(x) + a(x)) via folded params."""
    n = x.shape[0]
    d_out = wb_packed.shape[1]

    return pl.pallas_call(
        _fused_affine_kernel,
        out_shape=jax.ShapeDtypeStruct((n, d_out), x.dtype),
        in_specs=[
            pl.BlockSpec(memory_space=pltpu.MemorySpace.VMEM),
            pl.BlockSpec(memory_space=pltpu.MemorySpace.VMEM),
        ],
        out_specs=pl.BlockSpec(memory_space=pltpu.MemorySpace.VMEM),
    )(x, wb_packed)


if __name__ == "__main__":
    key = jax.random.PRNGKey(0)
    kx, k1, k2, k3, k4 = jax.random.split(key, 5)

    # Input matching `x = torch.randn(2, 2)`.
    x = jax.random.normal(kx, (2, 2), dtype=jnp.float32)

    # Deterministic parameter init (PyTorch Linear shapes).
    # a: Linear(2, 3) -> Wa (3, 2), ba (3,)
    wa = jax.random.uniform(k1, (3, 2), jnp.float32, -0.5, 0.5)
    ba = jax.random.uniform(k2, (3,), jnp.float32, -0.5, 0.5)
    # b: second linear consuming 3 features -> Wb (3, 3), bb (3,)
    wb = jax.random.uniform(k3, (3, 3), jnp.float32, -0.5, 0.5)
    bb = jax.random.uniform(k4, (3,), jnp.float32, -0.5, 0.5)

    # Fold once, at "parameter load" time (outside the per-call path).
    wb_packed = jax.block_until_ready(fold_params(wa, ba, wb, bb))

    out = model_forward(x, wb_packed)
    out = jax.block_until_ready(out)

    # Pure-JAX reference check of the ORIGINAL (unfused) forward.
    ref_y = x @ wa.T + ba
    ref_y = ref_y + ref_y
    ref = ref_y @ wb.T + bb
    assert out.shape == (2, 3)
    assert jnp.allclose(out, ref, atol=1e-5, rtol=1e-5)

    print("KERNEL_OK")
</pallas_src>

<mosaic_0001>
module attributes {stable_mosaic.version = 11 : i64} {
  func.func @_fused_affine_kernel(%arg0: memref<2x2xf32, #tpu.memory_space<vmem>>, %arg1: memref<3x3xf32, #tpu.memory_space<vmem>>, %arg2: memref<2x3xf32, #tpu.memory_space<vmem>>) attributes {dimension_semantics = [], scalar_prefetch = 0 : i64, scratch_operands = 0 : i64, tpu.core_type = #tpu.core_type<tc>} {
    %c0 = arith.constant 0 : index
    %c0_0 = arith.constant 0 : index
    %0 = vector.load %arg0[%c0, %c0_0] : memref<2x2xf32, #tpu.memory_space<vmem>>, vector<2x2xf32>
    %c0_1 = arith.constant 0 : index
    %c0_2 = arith.constant 0 : index
    %1 = vector.load %arg1[%c0_1, %c0_2] : memref<3x3xf32, #tpu.memory_space<vmem>>, vector<3x3xf32>
    %2 = vector.extract_strided_slice %0 {offsets = [0, 0], sizes = [2, 1], strides = [1, 1]} : vector<2x2xf32> to vector<2x1xf32>
    %3 = vector.extract_strided_slice %1 {offsets = [0, 0], sizes = [1, 3], strides = [1, 1]} : vector<3x3xf32> to vector<1x3xf32>
    %4 = vector.broadcast %2 : vector<2x1xf32> to vector<2x3xf32>
    %5 = vector.broadcast %3 : vector<1x3xf32> to vector<2x3xf32>
    %6 = arith.mulf %4, %5 : vector<2x3xf32>
    %7 = vector.extract_strided_slice %1 {offsets = [2, 0], sizes = [1, 3], strides = [1, 1]} : vector<3x3xf32> to vector<1x3xf32>
    %8 = vector.broadcast %7 : vector<1x3xf32> to vector<2x3xf32>
    %9 = arith.addf %6, %8 : vector<2x3xf32>
    %10 = vector.extract_strided_slice %0 {offsets = [0, 1], sizes = [2, 1], strides = [1, 1]} : vector<2x2xf32> to vector<2x1xf32>
    %11 = vector.extract_strided_slice %1 {offsets = [1, 0], sizes = [1, 3], strides = [1, 1]} : vector<3x3xf32> to vector<1x3xf32>
    %12 = vector.broadcast %10 : vector<2x1xf32> to vector<2x3xf32>
    %13 = vector.broadcast %11 : vector<1x3xf32> to vector<2x3xf32>
    %14 = arith.mulf %12, %13 : vector<2x3xf32>
    %15 = arith.addf %9, %14 : vector<2x3xf32>
    %c0_3 = arith.constant 0 : index
    %c0_4 = arith.constant 0 : index
    %16 = vector.load %arg2[%c0_3, %c0_4] : memref<2x3xf32, #tpu.memory_space<vmem>>, vector<2x3xf32>
    tpu.vector_store %arg2[%c0_3, %c0_4], %15 {strides = array<i32>} : memref<2x3xf32, #tpu.memory_space<vmem>>, vector<2x3xf32>,
    return
  }
}

</mosaic_0001>

<bundles_post_ra>
// kernel: tpu_custom_call.1
= control target key start
LH: loop header
LB: loop body
LE: loop exit
PB: predicated region body
PF: predicated region fallthrough
CT: control target
= control target key end

     0   :  { %7 = vsyncpa [#allocation3], 0  ;;  %s216_s0 = inlined_call_operand.hbm [shape: f32[2,2], index: 0, kind: input, shape index: {}]   ;;  %s217_s1 = inlined_call_operand.hbm [shape: f32[3,3], index: 1, kind: input, shape index: {}]   ;;  %s218_s2 = inlined_call_operand.hbm [shape: f32[2,3], index: 2, kind: output, shape index: {}]  }
   0x1   :  { %8 = vsyncpa [#allocation6], 0 }
   0x2   :  { %9 = vsyncpa [#allocation4], 0  ;;  %s160_s9 = smov [#allocation2]   ;;  %s161_s11 = smov [#allocation5]  }
   0x3   :  { %s16_s10 = sshll.u32 %s160_s9, 4  ;;  %s26_s12 = sshll.u32 %s161_s11, 4  ;;  %s17_s10 = int_to_ptr.vmem [resolvable:$true] %s16_s10  ;;  %s27_s12 = int_to_ptr.vmem [resolvable:$true] %s26_s12 }
   0x4   :  { %s88_s15 = scalar_lea.hbm %s216_s0, 32 }
   0x5   :  { %p89_p0 = scmp.ne.s32.totalorder %s216_s0, %s88_s15  ;;  %p92_p1 = scmp.lt.u32.totalorder %s88_s15, %s216_s0 }
   0x7   :  { %p94_p2 = pnand %p92_p1, %p89_p0 }
   0x9   :  { %97 = shalt.err (!%p94_p2)
}
   0xa   :  { %s98_s20 = scalar_lea.vmem %s17_s10, 32  ;;  %p103_p4 = scmp.lt.s32.totalorder %s17_s10, %s17_s10 }
   0xb   :  { %p99_p3 = scmp.ne.s32.totalorder %s17_s10, %s98_s20  ;;  %p104_p5 = scmp.lt.s32.totalorder %s98_s20, %s98_s20 }
   0xd   :  { %p105_p6 = por %p104_p5, %p103_p4 }
   0xf   :  { %p106_p7 = pnand %p105_p6, %p99_p3 }
  0x11   :  { %109 = shalt.err (!%p106_p7)
}
  0x12   :  { %19 = dma.hbm_to_vmem [thread:$0]  %s216_s0, 32, %s17_s10, [#allocation3]  }
  0x13   :  { %s110_s25 = scalar_lea.hbm %s217_s1, 64 }
  0x14   :  { %p111_p8 = scmp.ne.s32.totalorder %s217_s1, %s110_s25  ;;  %p114_p9 = scmp.lt.u32.totalorder %s110_s25, %s217_s1 }
  0x16   :  { %p116_p10 = pnand %p114_p9, %p111_p8 }
  0x18   :  { %119 = shalt.err (!%p116_p10)
}
  0x19   :  { %s120_s30 = scalar_lea.vmem %s27_s12, 64  ;;  %p125_p12 = scmp.lt.s32.totalorder %s27_s12, %s27_s12 }
  0x1a   :  { %p121_p11 = scmp.ne.s32.totalorder %s27_s12, %s120_s30  ;;  %p126_p13 = scmp.lt.s32.totalorder %s120_s30, %s120_s30 }
  0x1c   :  { %p127_p0 = por %p126_p13, %p125_p12 }
  0x1e   :  { %p128_p1 = pnand %p127_p0, %p121_p11 }
  0x20   :  { %131 = shalt.err (!%p128_p1)
}
  0x21   :  { %29 = dma.hbm_to_vmem [thread:$0]  %s217_s1, 64, %s27_s12, [#allocation6]  }
  0x22   :  { %154 = dma.done.wait [#allocation3], 32  }
  0x23   :  { %155 = vsyncadd [#allocation3], 4294967264 }
  0x24   :  { %156 = dma.done.wait [#allocation6], 64  }
  0x25   :  { %157 = vsyncadd [#allocation6], 4294967232  ;;  %v162_v0 = vmov 0   ;;  %v36_v1 = vld [vmem:[#allocation2] sm:$0x3]  ;;  %v163_v2 = vmov 1   ;;  %v43_v3 = vlaneseq }
  0x26   :  { %86 = vset.pattern.permute.xlu0 %v162_v0  ;;  %v37_v6 = vld [vmem:[#allocation5] sm:$0x7]  ;;  %s164_s1 = smov [#allocation7]   ;;  %vm63_vm0 = vcmask 17408  }
  0x27   :  { %40 = vperm.xlu0 %86, %v36_v1   ;;  %v44_v4 = vshrl.u32 %v43_v3, 7  ;;  %s71_s4 = sshll.u32 %s164_s1, 4  ;;  %s72_s4 = int_to_ptr.vmem [resolvable:$true] %s71_s4 }
  0x28   :  { %s132_s5 = scalar_lea.vmem %s72_s4, 32  ;;  %p137_p3 = scmp.lt.s32.totalorder %s72_s4, %s72_s4 }
  0x29   :  { %v45_v5 = vsub.s32 0, %v44_v4  ;;  %v50_v8 = vsub.s32 2, %v44_v4  ;;  %v59_v9 = vsub.s32 1, %v44_v4  ;;  %p133_p2 = scmp.ne.s32.totalorder %s72_s4, %s132_s5  ;;  %p138_p4 = scmp.lt.s32.totalorder %s132_s5, %s132_s5 }
  0x2b   :  { %87 = vset.pattern.permute.xlu0 %v163_v2  ;;  %v46_v7 = vrot.slane %v37_v6, %v45_v5  ;;  %v51_v11 = vrot.slane %v37_v6, %v50_v8  ;;  %v60_v13 = vrot.slane %v37_v6, %v59_v9  ;;  %p139_p5 = por %p138_p4, %p137_p3 }
  0x2c   :  { %54 = vperm.xlu0 %87, %v36_v1  }
  0x2d   :  { %p140_p6 = pnand %p139_p5, %p133_p2 }
  0xa6   :  { %v41_v10 = vpop.permute.xlu0 %40 }
  0xa7   :  { %v47_v12 = vmul.f32 %v46_v7, %v41_v10 }
  0xa9   :  { %v52_v15 = vadd.f32 %v51_v11, %v47_v12 }
  0xab   :  { %v55_v14 = vpop.permute.xlu0 %54 }
  0xac   :  { %v61_v16 = vmul.f32 %v60_v13, %v55_v14 }
  0xae   :  { %v62_v17 = vadd.f32 %v61_v16, %v52_v15 }
  0xb0   :  { %64 = vst.msk [vmem:[#allocation7] sm:$0x3] %vm63_vm0, %v62_v17 }
  0xb1   :  { %143 = shalt.err (!%p140_p6)
}
  0xb2   :  { %s144_s8 = scalar_lea.hbm %s218_s2, 32 }
  0xb3   :  { %p145_p7 = scmp.ne.s32.totalorder %s218_s2, %s144_s8  ;;  %p148_p8 = scmp.lt.u32.totalorder %s144_s8, %s218_s2 }
  0xb5   :  { %p150_p9 = pnand %p148_p8, %p145_p7 }
  0xb7   :  { %153 = shalt.err (!%p150_p9)
}
  0xb8   :  { %74 = dma.vmem_to_hbm [thread:$0]  %s72_s4, 32, %s218_s2, [#allocation4]  }
  0xb9   :  { %158 = dma.done.wait [#allocation4], 32  }
  0xba   :  { %159 = vsyncadd [#allocation4], 4294967264 }
  0xbb   :  { %78 = vsyncpa [#allocation3], 1 }
  0xbc   :  { %79 = vsyncpa [#allocation6], 1 }
  0xbd   :  { %80 = vsyncpa [#allocation4], 1 }

</bundles_post_ra>
